<compile_context>
chip_gen: v7x
topology: tpu7x:2x2x1
jax: 0.10.0
libtpu: 0.0.40
codegen_flags: <defaults>
</compile_context>

<pallas_src>
from functools import partial

import numpy as np
import jax
import jax.numpy as jnp
from jax.experimental import pallas as pl
from jax.experimental.pallas import tpu as pltpu


def _round_up(x, m):
    return ((x + m - 1) // m) * m


def _pick_tile(m, sub, cap=8192, min_steps=8):
    """Row-tile size for the patch-row axis.

    Large tiles amortize the fixed per-grid-step pipeline overhead; but keep at
    least `min_steps` steps (when m is large enough) so the 'parallel' grid axis
    can be sharded over v7x's two TensorCores and the DMA pipeline has depth.
    Must be a multiple of the sublane pack (8 for f32, 16 for bf16) unless it
    covers the whole (small) array (block == full dim is always legal).
    """
    if m <= sub:
        return m
    tm = _round_up(pl.cdiv(m, min_steps), sub)
    tm = max(sub, min(tm, cap))
    return min(tm, (m // sub) * sub)


def _patch_embed_kernel(x_ref, w_ref, b_ref, o_ref):
    """One row-tile of patches: o = x @ w + b (Conv2d with kernel == stride)."""
    acc = jnp.dot(x_ref[...], w_ref[...], preferred_element_type=jnp.float32)
    o_ref[...] = (acc + b_ref[...].astype(jnp.float32)).astype(o_ref.dtype)


def _patch_embed_ln_kernel(x_ref, w_ref, b_ref, g_ref, beta_ref, o_ref, *, eps):
    """Same as above with the norm layer (LayerNorm over embed_dim) fused in.

    embed_dim is fully contained in each block, so the reduction is exact.
    """
    acc = jnp.dot(x_ref[...], w_ref[...], preferred_element_type=jnp.float32)
    acc = acc + b_ref[...].astype(jnp.float32)
    mean = jnp.mean(acc, axis=-1, keepdims=True)
    var = jnp.mean(jnp.square(acc - mean), axis=-1, keepdims=True)
    normed = (acc - mean) * jax.lax.rsqrt(var + eps)
    o_ref[...] = (normed * g_ref[...].astype(jnp.float32)
                  + beta_ref[...].astype(jnp.float32)).astype(o_ref.dtype)


def patch_embed_forward(x, weight, bias, patch_size, ln_params=None, ln_eps=1e-5):
    """JAX/Pallas equivalent of PatchEmbed.forward.

    x      : (B, C, H, W)            NCHW, same as PyTorch
    weight : (E, C, ph, pw)          Conv2d weight (OIHW)
    bias   : (E,)
    Returns (tokens (B, Hp*Wp, E), Hp, Wp).
    """
    B, C, H, W = x.shape
    ph, pw = patch_size
    E = weight.shape[0]
    K = C * ph * pw

    # F.pad equivalent: zero-pad right/bottom so H, W divide the patch size.
    # Shapes are static, so this branch resolves at trace time.
    pad_h = (-H) % ph
    pad_w = (-W) % pw
    if pad_h or pad_w:
        x = jnp.pad(x, ((0, 0), (0, 0), (0, pad_h), (0, pad_w)))
    Hp = (H + pad_h) // ph
    Wp = (W + pad_w) // pw
    L = Hp * Wp
    M = B * L

    # Patchify (layout plumbing; flagged for XLA input fusion via
    # allow_input_fusion below so it doesn't have to round-trip through HBM):
    # (B,C,Hp,ph,Wp,pw) -> (B,Hp,Wp,C,ph,pw) -> (M, K), K ordered (c, kh, kw)
    # to match the Conv2d OIHW weight flattening.
    xp = (x.reshape(B, C, Hp, ph, Wp, pw)
            .transpose(0, 2, 4, 1, 3, 5)
            .reshape(M, K))
    w2 = weight.reshape(E, K).T            # (K, E)
    b2 = bias.reshape(1, E)

    # Tile only the patch-row axis; K and E are small and kept whole per block
    # (last block dims equal the full array dims, so the (8,128) rule is met).
    sub = 8 if jnp.dtype(x.dtype).itemsize >= 4 else 16
    TM = _pick_tile(M, sub)
    grid = (pl.cdiv(M, TM),)               # ragged tail block is fine (row-local)

    x_spec = pl.BlockSpec((TM, K), lambda m: (m, 0))
    w_spec = pl.BlockSpec((K, E), lambda m: (0, 0))
    v_spec = pl.BlockSpec((1, E), lambda m: (0, 0))
    o_spec = pl.BlockSpec((TM, E), lambda m: (m, 0))

    n_in = 3 if ln_params is None else 5
    cparams = pltpu.CompilerParams(
        dimension_semantics=("parallel",),
        vmem_limit_bytes=32 * 1024 * 1024,          # safe on v5e/v6e/v7x
        allow_input_fusion=[True] + [False] * (n_in - 1),  # fuse patchify in
    )

    if ln_params is None:
        out = pl.pallas_call(
            _patch_embed_kernel,
            out_shape=jax.ShapeDtypeStruct((M, E), x.dtype),
            grid=grid,
            in_specs=[x_spec, w_spec, v_spec],
            out_specs=o_spec,
            compiler_params=cparams,
        )(xp, w2, b2)
    else:
        gamma, beta = ln_params
        out = pl.pallas_call(
            partial(_patch_embed_ln_kernel, eps=float(ln_eps)),
            out_shape=jax.ShapeDtypeStruct((M, E), x.dtype),
            grid=grid,
            in_specs=[x_spec, w_spec, v_spec, v_spec, v_spec],
            out_specs=o_spec,
            compiler_params=cparams,
        )(xp, w2, b2, gamma.reshape(1, E), beta.reshape(1, E))

    # (M, E) -> (B, L, E) is a pure reshape (no extra HBM copy).
    return out.reshape(B, L, E), Hp, Wp


class PatchEmbed:
    """Mirror of the PyTorch PatchEmbed module (Conv2d patch projection + norm)."""

    def __init__(self, patch_size=4, in_c=1, embed_dim=96, norm_layer=None,
                 *, key=None, dtype=jnp.float32):
        self.patch_size = (patch_size, patch_size)
        self.in_chans = in_c
        self.embed_dim = embed_dim
        if key is None:
            key = jax.random.PRNGKey(0)
        k_w, k_b = jax.random.split(key)
        fan_in = in_c * patch_size * patch_size
        bound = 1.0 / float(np.sqrt(fan_in))
        # Same init family as PyTorch Conv2d defaults (uniform in +-1/sqrt(fan_in)).
        self.weight = jax.random.uniform(
            k_w, (embed_dim, in_c, patch_size, patch_size), dtype=dtype,
            minval=-bound, maxval=bound)
        self.bias = jax.random.uniform(
            k_b, (embed_dim,), dtype=dtype, minval=-bound, maxval=bound)
        if norm_layer:  # norm_layer analogue == LayerNorm(embed_dim), fused in kernel
            self.norm_params = (jnp.ones((embed_dim,), dtype),
                                jnp.zeros((embed_dim,), dtype))
        else:
            self.norm_params = None
        self.norm_eps = 1e-5

    def __call__(self, x):
        return patch_embed_forward(
            x, self.weight, self.bias, self.patch_size,
            ln_params=self.norm_params, ln_eps=self.norm_eps)


if __name__ == "__main__":
    key = jax.random.PRNGKey(0)
    k_x, k_p, k_x2 = jax.random.split(key, 3)

    module = PatchEmbed(patch_size=4, in_c=1, embed_dim=96, norm_layer=None, key=k_p)

    def ref_forward(x, mod):
        ph, pw = mod.patch_size
        _, _, H, W = x.shape
        pad_h = (-H) % ph
        pad_w = (-W) % pw
        if pad_h or pad_w:
            x = jnp.pad(x, ((0, 0), (0, 0), (0, pad_h), (0, pad_w)))
        y = jax.lax.conv_general_dilated(
            x, mod.weight, window_strides=(ph, pw), padding="VALID",
            dimension_numbers=("NCHW", "OIHW", "NCHW"),
            precision=jax.lax.Precision.HIGHEST)
        y = y + mod.bias.reshape(1, -1, 1, 1)
        B, E, Hp, Wp = y.shape
        y = y.reshape(B, E, Hp * Wp).transpose(0, 2, 1)
        if mod.norm_params is not None:
            gamma, beta = mod.norm_params
            mu = jnp.mean(y, axis=-1, keepdims=True)
            var = jnp.mean(jnp.square(y - mu), axis=-1, keepdims=True)
            y = (y - mu) * jax.lax.rsqrt(var + mod.norm_eps) * gamma + beta
        return y, Hp, Wp

    # The kernel now uses default (single-pass bf16) MXU precision per the perf
    # review; compare against a HIGHEST-precision reference with a tolerance
    # that covers bf16 input quantization (K=16, so the error stays ~0.5%).
    TOL = dict(rtol=2e-2, atol=2e-2)

    # Case 1: evenly divisible spatial dims (no padding path).  M=32, TM=8 -> 4 steps.
    x = jax.random.normal(k_x, (2, 1, 16, 16), dtype=jnp.float32)
    y, Hn, Wn = module(x)
    y = jax.block_until_ready(y)
    y_ref, Hr, Wr = ref_forward(x, module)
    assert (Hn, Wn) == (Hr, Wr) == (4, 4)
    np.testing.assert_allclose(np.asarray(y), np.asarray(y_ref), **TOL)

    # Case 2: non-divisible spatial dims -> F.pad-equivalent path AND a ragged
    # last grid block (M=50, TM=8 -> 7 steps, tail block partially OOB).
    x2 = jax.random.normal(k_x2, (2, 1, 17, 19), dtype=jnp.float32)
    y2, H2, W2 = module(x2)
    y2 = jax.block_until_ready(y2)
    y2_ref, H2r, W2r = ref_forward(x2, module)
    assert (H2, W2) == (H2r, W2r) == (5, 5)
    np.testing.assert_allclose(np.asarray(y2), np.asarray(y2_ref), **TOL)

    # Case 3: norm_layer analogue — LayerNorm fused into the same kernel.
    module_ln = PatchEmbed(patch_size=4, in_c=1, embed_dim=96, norm_layer=True, key=k_p)
    y3, _, _ = module_ln(x)
    y3 = jax.block_until_ready(y3)
    y3_ref, _, _ = ref_forward(x, module_ln)
    np.testing.assert_allclose(np.asarray(y3), np.asarray(y3_ref), **TOL)

    print("KERNEL_OK")
</pallas_src>

<mosaic_0001>
module attributes {stable_mosaic.version = 11 : i64} {
  func.func @_patch_embed_kernel(%arg0: i32, %arg1: memref<8x16xf32, #tpu.memory_space<vmem>>, %arg2: memref<16x96xf32, #tpu.memory_space<vmem>>, %arg3: memref<1x96xf32, #tpu.memory_space<vmem>>, %arg4: memref<8x96xf32, #tpu.memory_space<vmem>>) attributes {dimension_semantics = [#tpu.dimension_semantics<parallel>], iteration_bounds = array<i64: 4>, scalar_prefetch = 0 : i64, scratch_operands = 0 : i64, tpu.core_type = #tpu.core_type<tc>, window_params = [{transform_indices = @transform_0, window_bounds = array<i64: 8, 16>}, {pipeline_mode = #tpu.pipeline_mode<synchronous>, transform_indices = @transform_1, window_bounds = array<i64: 16, 96>}, {pipeline_mode = #tpu.pipeline_mode<synchronous>, transform_indices = @transform_2, window_bounds = array<i64: 1, 96>}, {transform_indices = @transform_3, window_bounds = array<i64: 8, 96>}]} {
    %c0 = arith.constant 0 : index
    %c0_0 = arith.constant 0 : index
    %0 = vector.load %arg1[%c0, %c0_0] : memref<8x16xf32, #tpu.memory_space<vmem>>, vector<8x16xf32>
    %c0_1 = arith.constant 0 : index
    %c0_2 = arith.constant 0 : index
    %1 = vector.load %arg2[%c0_1, %c0_2] : memref<16x96xf32, #tpu.memory_space<vmem>>, vector<16x96xf32>
    %cst = arith.constant dense<0.000000e+00> : vector<8x96xf32>
    %2 = tpu.matmul %0, %1, %cst {dimension_numbers = #tpu.dot_dimension_numbers<[1], [0], [0], [1], [0, 0, 1, 1], [], []>} : vector<8x16xf32>, vector<16x96xf32>, vector<8x96xf32> -> vector<8x96xf32>
    %c0_3 = arith.constant 0 : index
    %c0_4 = arith.constant 0 : index
    %3 = vector.load %arg3[%c0_3, %c0_4] : memref<1x96xf32, #tpu.memory_space<vmem>>, vector<1x96xf32>
    %4 = vector.broadcast %3 : vector<1x96xf32> to vector<8x96xf32>
    %5 = arith.addf %2, %4 : vector<8x96xf32>
    %c0_5 = arith.constant 0 : index
    %c0_6 = arith.constant 0 : index
    %6 = vector.load %arg4[%c0_5, %c0_6] : memref<8x96xf32, #tpu.memory_space<vmem>>, vector<8x96xf32>
    tpu.vector_store %arg4[%c0_5, %c0_6], %5 {strides = array<i32>} : memref<8x96xf32, #tpu.memory_space<vmem>>, vector<8x96xf32>,
    return
  }
  func.func @transform_0(%arg0: i32) -> (i32, i32) {
    %c0_i32 = arith.constant 0 : i32
    %c0_i32_0 = arith.constant 0 : i32
    return %arg0, %c0_i32 : i32, i32
  }
  func.func @transform_1(%arg0: i32) -> (i32, i32) {
    %c0_i32 = arith.constant 0 : i32
    %c0_i32_0 = arith.constant 0 : i32
    %c0_i32_1 = arith.constant 0 : i32
    return %c0_i32, %c0_i32_0 : i32, i32
  }
  func.func @transform_2(%arg0: i32) -> (i32, i32) {
    %c0_i32 = arith.constant 0 : i32
    %c0_i32_0 = arith.constant 0 : i32
    %c0_i32_1 = arith.constant 0 : i32
    return %c0_i32, %c0_i32_0 : i32, i32
  }
  func.func @transform_3(%arg0: i32) -> (i32, i32) {
    %c0_i32 = arith.constant 0 : i32
    %c0_i32_0 = arith.constant 0 : i32
    return %arg0, %c0_i32 : i32, i32
  }
}

</mosaic_0001>

<bundles_post_ra>
// kernel: tpu_custom_call.1
= control target key start
LH: loop header
LB: loop body
LE: loop exit
PB: predicated region body
PF: predicated region fallthrough
CT: control target
= control target key end

     0   :  { %8 = vsyncpa [#allocation3], 0  ;;  %s589_s0 = inlined_call_operand.vmem [shape: f32[32,16], index: 0, kind: input, shape index: {}]   ;;  %s590_s1 = inlined_call_operand.vmem [shape: f32[16,96], index: 1, kind: input, shape index: {}]   ;;  %s591_s2 = inlined_call_operand.vmem [shape: f32[1,96], index: 2, kind: input, shape index: {}]   ;;  %s592_s3 = inlined_call_operand.hbm [shape: f32[32,96], index: 3, kind: output, shape index: {}]  }
   0x1   :  { %10 = vsyncpa [#allocation3 + $0x1], 0  ;;  %s480_s12 = smov 0   ;;  %s482_s13 = smov 0  }
   0x2   :  { %s484_s14 = smov 0   ;;  %s486_s15 = smov 0  }
   0x3 LB: > { %s501_s16 = sadd.s32 4294967295, %s454_s15   ;;  %s325_s17 = sadd.s32 4294967294, %s454_s15   ;;  %s454_s15 = sphi %s486_s15, %s598_s15   ;;  %s450_s14 = sphi %s484_s14, %s597_s14   ;;  %s446_s13 = sphi %s482_s13, %s596_s13   ;;  %s442_s12 = sphi %s480_s12, %s595_s12  }
   0x4   : > { %s505_s18 = sadd.s32 1, %s454_s15   ;;  %s91_s19 = sadd.s32 1, %s450_s14 }
   0x5   : > { %s88_s20 = ssub.s32 %s454_s15, %s505_s18  ;;  %p101_p0 = scmp.ne.s32.totalorder %s450_s14, %s446_s13 }
   0x6   : > { %p89_p1 = scmp.eq.s32.totalorder %s88_s20, 0  ;;  %p102_p2 = scmp.eq.s32.totalorder %s501_s16, 3 }
   0x7   : > { %p107_p3 = scmp.ne.s32.totalorder %s446_s13, %s442_s12  ;;  %p108_p4 = scmp.eq.s32.totalorder %s325_s17, 3 }
   0x8   : > { %s516_s21 = scalar_select %p89_p1, %s450_s14, %s91_s19  }
   0x9   : > { %p518_p5 = por %p102_p2, %p101_p0  ;;  %p522_p6 = por %p108_p4, %p107_p3 }
   0xa   : > { %p328_p7 = scmp.ge.s32.totalorder %s454_s15, 1  ;;  %p139_p8 = scmp.lt.s32.totalorder %s454_s15, 5 }
   0xc   : > { %p140_p9 = pnand %p328_p7, %p139_p8 }
   0xd   : > { %v167_v0 = vld [vmem:[%s590_s1] sm:$0xff] (!%p140_p9)  ;;  %v168_v1 = vld [vmem:[%s590_s1 + $0x8] sm:$0xff] (!%p140_p9)  ;;  %p162_p10 = scmp.lt.s32.totalorder (!%p140_p9), %s501_s16, 3  ;;  %v456_v2 = vmov (!%p140_p9), 0.0|0.0   ;;  %vm457_vm0 = vmmov (!%p140_p9), 0   ;;  %v458_v4 = vmov (!%p140_p9), 0.0  }
   0xe   : > { %143 = sbr.rel (%p140_p9) target bundleno = 254 (0xfe), region = 32  ;;  %347 = vmatprep.subr.bf16.mxu0 (!%p140_p9), %v456_v2  ;;  %v348_v3 = vpack.c.bf16 (!%p140_p9), %v168_v1, %v167_v0  ;;  %344 = vmatprep.mubr.msk.f32.mxu0 (!%p140_p9), %vm457_vm0, %v458_v4  ;;  %vm176_vm1 = vcmask (!%p140_p9), 130048   ;;  %s159_s6 = sand.u32 (!%p140_p9), 1, %s446_s13   ;;  %v331_v6 = vld [vmem:[%s591_s2] ss:$0 sm:$0xff] (!%p140_p9)  ;;  %vm250_vm2 = vcmask (!%p140_p9), 785408  }
   0xf   : > { %s329_s7 = sshll.u32 (!%p140_p9), %s159_s6, 3  ;;  %s334_s10 = sshll.u32 (!%p140_p9), %s501_s16, 7 }
  0x10   : > { %349 = vmatpush3.bf16.msra.mxu0 (!%p140_p9), %v348_v3  ;;  %s161_s11 = scalar_lea.vmem (!%p140_p9), [#allocation2], %s329_s7  ;;  %s547_s24 = scalar_lea.hbm (!%p140_p9), %s592_s3, %s334_s10 }
  0x11   : > { %s266_s17 = sshll.u32 (!%p140_p9), %s161_s11, 4  ;;  %s253_s25 = scalar_lea.sflag (!%p140_p9), [#allocation3], %s159_s6  ;;  %s549_s17 = int_to_ptr.vmem [resolvable:$true] %s266_s17 }
  0x12   : > { %s392_s26 = scalar_lea.vmem (!%p140_p9), %s549_s17, 128 }
  0x13   : > { %p393_p11 = scmp.ne.s32.totalorder (!%p140_p9), %s549_s17, %s392_s26 }
  0x15   : > { %s163_s28 = scalar_select %p162_p10, %s501_s16, 3 }
  0x16   : > { %p394_p12 = pnand %p393_p11, %p518_p5  ;;  %s459_s16 = smov [#allocation2]  }
  0x17   : > { %s330_s29 = sshll.u32 %s163_s28, 3  ;;  %s396_s27 = sshll.u32 %s459_s16, 4  ;;  %s397_s27 = int_to_ptr.vmem [resolvable:$false] %s396_s27 }
  0x18   : > { %s165_s5 = scalar_lea.vmem %s589_s0, %s330_s29  ;;  %p395_p13 = pneg %p394_p12 }
  0x19   : > { %v166_v5 = vld [vmem:[%s165_s5] sm:$0xff]  ;;  %s398_s28 = scalar_lea.vmem %s397_s27, 256  ;;  %p399_p0 = scmp.lt.s32.totalorder %s549_s17, %s397_s27 }
  0x1a   : > { %345 = vmatmul.mubr.msk.f32.vlgmr.msra.gmra.mrb[0].mxu0 %vm176_vm1, %v166_v5  ;;  %p400_p1 = scmp.lt.s32.totalorder %s398_s28, %s392_s26 }
  0x1c   : > { %p401_p2 = por %p400_p1, %p399_p0 }
  0x1e   : > { %p402_p3 = pnand %p401_p2, %p395_p13 }
  0xed   : > { %v246_v7 = vpop.f32.mrb[0].mxu0 }
  0xee   : > { %v247_v8 = vadd.f32 %v331_v6, %v246_v7  ;;  %v346_v9 = vpop.f32.mrb[1].mxu0 }
  0xf0   : > { %251 = vst.msk [vmem:[%s161_s11] sm:$0xff] %vm250_vm2, %v247_v8 }
  0xf1   : > { %405 = shalt.err (!%p402_p3)
}
  0xf2   : > { %s406_s29 = scalar_lea.hbm %s547_s24, 128  ;;  %s410_s5 = scalar_lea.hbm %s592_s3, 512 }
  0xf3   : > { %p407_p4 = scmp.ne.s32.totalorder %s547_s24, %s406_s29  ;;  %p411_p9 = scmp.lt.u32.totalorder %s547_s24, %s592_s3 }
  0xf4   : > { %p412_p10 = scmp.lt.u32.totalorder %s410_s5, %s406_s29  ;;  %p414_p12 = scmp.lt.u32.totalorder %s406_s29, %s547_s24 }
  0xf5   : > { %p408_p7 = pnand %p407_p4, %p518_p5 }
  0xf6   : > { %p413_p11 = por %p412_p10, %p411_p9 }
  0xf7   : > { %p409_p8 = pneg %p408_p7 }
  0xf8   : > { %p415_p13 = por %p414_p12, %p413_p11 }
  0xfa   : > { %p416_p0 = pnand %p415_p13, %p409_p8 }
  0xfc   : > { %419 = shalt.err (!%p416_p0)
}
  0xfd   : > { %350 = dma.vmem_to_hbm [thread:$0]  (%p518_p5), %s549_s17, 128, %s547_s24, %s253_s25  }
  0xfe PF: > { %p356_p1 = scmp.ge.s32.totalorder %s454_s15, 2  ;;  %s278_s8 = sand.u32 1, %s442_s12  }
  0xff   : > { %s279_s9 = scalar_lea.sflag [#allocation3], %s278_s8 }
 0x100   : > { %p353_p2 = pnand %p356_p1, %p522_p6 }
 0x102   : > { %437 = dma.done.wait (!%p353_p2), %s279_s9, 128  }
 0x103   : > { %439 = vsyncadd (!%p353_p2), %s279_s9, 4294967168  ;;  %p13_p3 = scmp.ge.s32.totalorder %s505_s18, 6   ;;  %s595_s12 = smov %s446_s13 }
 0x104   : > { %s596_s13 = smov %s450_s14  ;;  %s597_s14 = smov %s516_s21 }
 0x105   : > { %s598_s15 = smov %s505_s18  ;;  %15 = sbr.rel (!%p13_p3) target bundleno = 3 (0x3), region = 67 }
 0x10c   :  { %284 = vsyncpa [#allocation3], 1 }
 0x10d   :  { %286 = vsyncpa [#allocation3 + $0x1], 1 }

</bundles_post_ra>
